<compile_context>
chip_gen: v6e
topology: v6e:2x2x1
jax: 0.10.0
libtpu: 0.0.40
codegen_flags: <defaults>
</compile_context>

<pallas_src>
import jax
import jax.numpy as jnp
import numpy as np
from jax.experimental import pallas as pl
from jax.experimental.pallas import tpu as pltpu

# ---- GLULinear hyperparameters ----------------------------------------------
B, S = 2, 8          # batch, sequence
D_IN = 32            # input_dim
D_OUT = 128          # output_dim (multiple of 128 -> lane-dense output store)
GLU_TYPE = "swish"   # gate activation ('swish' as used in phi-4-mm conformer)


def _glu_act(gate):
    # Resolved at trace time (Python-level branch on the static config).
    if GLU_TYPE == "swish":
        return gate * jax.nn.sigmoid(gate)
    if GLU_TYPE == "sigmoid":
        return jax.nn.sigmoid(gate)
    if GLU_TYPE == "relu":
        return jnp.maximum(gate, 0.0)
    if GLU_TYPE == "gelu":
        return jax.nn.gelu(gate)
    return gate  # identity


def glu_linear_kernel(x_ref, wb_ref, o_ref):
    # x_ref : (N, D_IN)            flattened (B*S, D_IN) activations
    # wb_ref: (D_IN + 1, 2*D_OUT)  rows [0:D_IN] = W^T, row D_IN = bias
    x = x_ref[...].astype(jnp.float32)
    w = wb_ref[:D_IN, :].astype(jnp.float32)
    b = wb_ref[D_IN:D_IN + 1, :].astype(jnp.float32)

    y = jnp.dot(x, w, preferred_element_type=jnp.float32) + b   # (N, 2*D_OUT)
    half = y[:, :D_OUT]                                          # first chunk
    gate = y[:, D_OUT:]                                          # second chunk
    o_ref[...] = (half * _glu_act(gate)).astype(o_ref.dtype)


def glu_linear(x, w_t, bias):
    """x: (B, S, D_IN); w_t: (D_IN, 2*D_OUT) (transposed nn.Linear weight); bias: (2*D_OUT,)."""
    b_, s_, d_in = x.shape
    n = b_ * s_
    x2 = x.reshape(n, d_in)

    # Host-side packing: one contiguous parameter slab -> a single DMA.
    wb = jnp.concatenate([w_t, bias.reshape(1, -1)], axis=0)     # (D_IN+1, 2*D_OUT)

    out = pl.pallas_call(
        glu_linear_kernel,
        out_shape=jax.ShapeDtypeStruct((n, D_OUT), x.dtype),
        grid=(1,),                                               # single grid step
        in_specs=[
            pl.BlockSpec((n, d_in), lambda i: (0, 0)),
            pl.BlockSpec(wb.shape, lambda i: (0, 0)),
        ],
        out_specs=pl.BlockSpec((n, D_OUT), lambda i: (0, 0)),
        compiler_params=pltpu.CompilerParams(
            dimension_semantics=("arbitrary",)),
    )(x2, wb)
    return out.reshape(b_, s_, D_OUT)


def ref_forward(x, w_t, bias):
    """Pure-JAX reference mirroring the PyTorch GLULinear forward."""
    y = x @ w_t + bias
    half = y[..., :D_OUT]
    gate = y[..., D_OUT:]
    return half * _glu_act(gate)


if __name__ == "__main__":
    key = jax.random.PRNGKey(0)
    kx, kw, kb = jax.random.split(key, 3)
    x = jax.random.normal(kx, (B, S, D_IN), jnp.float32)
    # nn.Linear(D_IN, 2*D_OUT) stores weight as (2*D_OUT, D_IN); we keep the
    # transposed matmul form (D_IN, 2*D_OUT) host-side.
    w_t = jax.random.normal(kw, (D_IN, 2 * D_OUT), jnp.float32) * 0.1
    bias = jax.random.normal(kb, (2 * D_OUT,), jnp.float32) * 0.1

    out = jax.block_until_ready(glu_linear(x, w_t, bias))
    ref = ref_forward(x, w_t, bias)
    np.testing.assert_allclose(np.asarray(out), np.asarray(ref),
                               atol=1e-3, rtol=1e-3)
    print("KERNEL_OK")
</pallas_src>

<mosaic_0001>
module attributes {stable_mosaic.version = 11 : i64} {
  func.func @glu_linear_kernel(%arg0: i32, %arg1: memref<16x32xf32, #tpu.memory_space<vmem>>, %arg2: memref<33x256xf32, #tpu.memory_space<vmem>>, %arg3: memref<16x128xf32, #tpu.memory_space<vmem>>) attributes {dimension_semantics = [#tpu.dimension_semantics<arbitrary>], iteration_bounds = array<i64: 1>, scalar_prefetch = 0 : i64, scratch_operands = 0 : i64, tpu.core_type = #tpu.core_type<tc>, window_params = [{pipeline_mode = #tpu.pipeline_mode<synchronous>, transform_indices = @transform_0, window_bounds = array<i64: 16, 32>}, {pipeline_mode = #tpu.pipeline_mode<synchronous>, transform_indices = @transform_1, window_bounds = array<i64: 33, 256>}, {pipeline_mode = #tpu.pipeline_mode<synchronous>, transform_indices = @transform_2, window_bounds = array<i64: 16, 128>}]} {
    %c0 = arith.constant 0 : index
    %c0_0 = arith.constant 0 : index
    %0 = vector.load %arg1[%c0, %c0_0] : memref<16x32xf32, #tpu.memory_space<vmem>>, vector<16x32xf32>
    %c0_1 = arith.constant 0 : index
    %c0_2 = arith.constant 0 : index
    %1 = vector.load %arg2[%c0_1, %c0_2] : memref<33x256xf32, #tpu.memory_space<vmem>>, vector<32x256xf32>
    %c32 = arith.constant 32 : index
    %c0_3 = arith.constant 0 : index
    %2 = vector.load %arg2[%c32, %c0_3] : memref<33x256xf32, #tpu.memory_space<vmem>>, vector<1x256xf32>
    %cst = arith.constant dense<0.000000e+00> : vector<16x256xf32>
    %3 = tpu.matmul %0, %1, %cst {dimension_numbers = #tpu.dot_dimension_numbers<[1], [0], [0], [1], [0, 0, 1, 1], [], []>} : vector<16x32xf32>, vector<32x256xf32>, vector<16x256xf32> -> vector<16x256xf32>
    %4 = vector.broadcast %2 : vector<1x256xf32> to vector<16x256xf32>
    %5 = arith.addf %3, %4 : vector<16x256xf32>
    %6 = vector.extract_strided_slice %5 {offsets = [0, 0], sizes = [16, 128], strides = [1, 1]} : vector<16x256xf32> to vector<16x128xf32>
    %7 = vector.extract_strided_slice %5 {offsets = [0, 128], sizes = [16, 128], strides = [1, 1]} : vector<16x256xf32> to vector<16x128xf32>
    %8 = arith.negf %7 : vector<16x128xf32>
    %9 = math.exp %8 : vector<16x128xf32>
    %cst_4 = arith.constant 1.000000e+00 : f32
    %10 = vector.broadcast %cst_4 : f32 to vector<16x128xf32>
    %11 = arith.addf %10, %9 : vector<16x128xf32>
    %12 = arith.divf %10, %11 : vector<16x128xf32>
    %13 = arith.mulf %7, %12 : vector<16x128xf32>
    %14 = arith.mulf %6, %13 : vector<16x128xf32>
    %c0_5 = arith.constant 0 : index
    %c0_6 = arith.constant 0 : index
    %15 = vector.load %arg3[%c0_5, %c0_6] : memref<16x128xf32, #tpu.memory_space<vmem>>, vector<16x128xf32>
    tpu.vector_store %arg3[%c0_5, %c0_6], %14 {strides = array<i32>} : memref<16x128xf32, #tpu.memory_space<vmem>>, vector<16x128xf32>,
    return
  }
  func.func @transform_0(%arg0: i32) -> (i32, i32) {
    %c0_i32 = arith.constant 0 : i32
    %c0_i32_0 = arith.constant 0 : i32
    %c0_i32_1 = arith.constant 0 : i32
    return %c0_i32, %c0_i32_0 : i32, i32
  }
  func.func @transform_1(%arg0: i32) -> (i32, i32) {
    %c0_i32 = arith.constant 0 : i32
    %c0_i32_0 = arith.constant 0 : i32
    %c0_i32_1 = arith.constant 0 : i32
    return %c0_i32, %c0_i32_0 : i32, i32
  }
  func.func @transform_2(%arg0: i32) -> (i32, i32) {
    %c0_i32 = arith.constant 0 : i32
    %c0_i32_0 = arith.constant 0 : i32
    %c0_i32_1 = arith.constant 0 : i32
    return %c0_i32, %c0_i32_0 : i32, i32
  }
}

</mosaic_0001>

<bundles_post_ra>
// kernel: tpu_custom_call.1
= control target key start
LH: loop header
LB: loop body
LE: loop exit
PB: predicated region body
PF: predicated region fallthrough
CT: control target
= control target key end

     0   :  { %7 = vsyncpa [#allocation3], 0  ;;  %s315_s0 = inlined_call_operand.hbm [shape: f32[16,32], index: 0, kind: input, shape index: {}]   ;;  %s316_s1 = inlined_call_operand.hbm [shape: f32[33,256], index: 1, kind: input, shape index: {}]   ;;  %s317_s2 = inlined_call_operand.hbm [shape: f32[16,128], index: 2, kind: output, shape index: {}]  }
   0x1   :  { %8 = vsyncpa [#allocation6], 0 }
   0x2   :  { %9 = vsyncpa [#allocation4], 0  ;;  %s277_s9 = smov [#allocation2]  }
   0x3   :  { %s15_s10 = sshll.u32 %s277_s9, 4  ;;  %s16_s10 = int_to_ptr.vmem [resolvable:$true] %s15_s10 }
   0x4   :  { %s219_s11 = scalar_lea.vmem %s16_s10, 256  ;;  %p224_p1 = scmp.lt.s32.totalorder %s16_s10, %s16_s10 }
   0x5   :  { %p220_p0 = scmp.ne.s32.totalorder %s16_s10, %s219_s11  ;;  %p225_p2 = scmp.lt.s32.totalorder %s219_s11, %s219_s11 }
   0x7   :  { %p226_p3 = por %p225_p2, %p224_p1 }
   0x9   :  { %p227_p4 = pnand %p226_p3, %p220_p0 }
   0xb   :  { %230 = shalt.err (!%p227_p4)
}
   0xc   :  { %s278_s12 = smov 128   ;;  %s279_s13 = smov 8  }
   0xd   :  { %21 = dma.hbm_to_vmem [thread:$0]  %s315_s0, 256, %s16_s10, [#allocation3], %s278_s12, %s278_s12, %s279_s13  }
   0xe   :  { %s280_s16 = smov [#allocation5]  }
   0xf   :  { %s27_s17 = sshll.u32 %s280_s16, 4  ;;  %s28_s17 = int_to_ptr.vmem [resolvable:$true] %s27_s17 }
  0x10   :  { %s239_s18 = scalar_lea.vmem %s28_s17, 1280  ;;  %p244_p6 = scmp.lt.s32.totalorder %s28_s17, %s28_s17 }
  0x11   :  { %p240_p5 = scmp.ne.s32.totalorder %s28_s17, %s239_s18  ;;  %p245_p7 = scmp.lt.s32.totalorder %s239_s18, %s239_s18 }
  0x13   :  { %p246_p8 = por %p245_p7, %p244_p6 }
  0x15   :  { %p247_p9 = pnand %p246_p8, %p240_p5 }
  0x17   :  { %250 = shalt.err (!%p247_p9)
}
  0x18   :  { %s281_s19 = smov 256   ;;  %s282_s20 = smov 16  }
  0x19   :  { %33 = dma.hbm_to_vmem [thread:$0]  %s316_s1, 1280, %s28_s17, [#allocation6], %s281_s19, %s281_s19, %s282_s20  }
  0x1a   :  { %271 = dma.done.wait [#allocation3], 256  }
  0x1b   :  { %272 = vsyncadd [#allocation3], 4294967040 }
  0x1c   :  { %273 = dma.done.wait [#allocation6], 1280  }
  0x1d   :  { %274 = vsyncadd [#allocation6], 4294966016  ;;  %v283_v0 = vmov 0.0   ;;  %v49_v1 = vld [vmem:[#allocation5 + $0x38] sm:$0xff]  ;;  %v48_v2 = vld [vmem:[#allocation5 + $0x30] sm:$0xff]  ;;  %vm63_vm0 = vcmask 261120   ;;  %v53_v11 = vlaneseq }
  0x1e   :  { %134 = vmatprep.mubr.f32.mxu0 %v283_v0  ;;  %140 = vmatprep.mubr.f32.mxu1 %v283_v0  ;;  %v47_v3 = vld [vmem:[#allocation5 + $0x28] sm:$0xff]  ;;  %v46_v4 = vld [vmem:[#allocation5 + $0x20] sm:$0xff]  ;;  %v45_v5 = vld [vmem:[#allocation5 + $0x18] sm:$0xff]  ;;  %s284_s0 = smov [#allocation7]  }
  0x1f   :  { %94 = vmatprep.subr.mxu0 %v49_v1  ;;  %187 = vmatprep.subr.mxu1 %v49_v1  ;;  %v44_v6 = vld [vmem:[#allocation5 + $0x10] sm:$0xff]  ;;  %v43_v7 = vld [vmem:[#allocation5 + $0x8] sm:$0xff]  ;;  %v42_v8 = vld [vmem:[#allocation5] sm:$0xff]  ;;  %v54_v12 = vshrl.u32 %v53_v11, 7  ;;  %s170_s1 = sshll.u32 %s284_s0, 4  ;;  %s171_s1 = int_to_ptr.vmem [resolvable:$true] %s170_s1 }
  0x20   :  { %95 = vmatpush1.msra.mxu0 %v48_v2  ;;  %191 = vmatpush1.msra.mxu1 %v48_v2  ;;  %v40_v9 = vld [vmem:[#allocation2] sm:$0xff]  ;;  %v41_v10 = vld [vmem:[#allocation2 + $0x8] sm:$0xff]  ;;  %v51_v14 = vld [vmem:[#allocation5 + $0x40] ss:$8 sm:$0x3]  ;;  %s251_s23 = scalar_lea.vmem %s171_s1, 256  ;;  %p256_p11 = scmp.lt.s32.totalorder %s171_s1, %s171_s1 }
  0x21   :  { %96 = vmatprep.subr.mxu0 %v47_v3  ;;  %188 = vmatprep.subr.mxu1 %v47_v3  ;;  %v59_v13 = vsub.s32 1, %v54_v12  ;;  %v55_v28 = vsub.s32 0, %v54_v12  ;;  %p252_p10 = scmp.ne.s32.totalorder %s171_s1, %s251_s23  ;;  %p257_p12 = scmp.lt.s32.totalorder %s251_s23, %s251_s23 }
  0x22   :  { %97 = vmatpush1.msra.mxu0 %v46_v4  ;;  %192 = vmatpush1.msra.mxu1 %v46_v4 }
  0x23   :  { %98 = vmatprep.subr.mxu0 %v45_v5  ;;  %189 = vmatprep.subr.mxu1 %v45_v5  ;;  %v60_v15 = vrot.slane %v51_v14, %v59_v13  ;;  %v56_v29 = vrot.slane %v51_v14, %v55_v28  ;;  %p258_p13 = por %p257_p12, %p256_p11 }
  0x24   :  { %99 = vmatpush1.msra.mxu0 %v44_v6  ;;  %193 = vmatpush1.msra.mxu1 %v44_v6 }
  0x25   :  { %100 = vmatprep.subr.mxu0 %v43_v7  ;;  %190 = vmatprep.subr.mxu1 %v43_v7  ;;  %p259_p0 = pnand %p258_p13, %p252_p10 }
  0x26   :  { %101 = vmatpush1.msra.mxu0 %v42_v8  ;;  %194 = vmatpush1.msra.mxu1 %v42_v8 }
  0x27   :  { %183 = vmatmul.mubr.msk.f32.vlgmr.msra.gmra.mxu0 %vm63_vm0, %v40_v9  ;;  %184 = vmatmul.mubr.msk.f32.vlgmr.msra.gmra.mxu1 %vm63_vm0, %v41_v10 }
  0xe7   :  { %v136_v16 = vpop.f32.mrf.mxu0  ;;  %v142_v17 = vpop.f32.mrf.mxu1 }
  0xe8   :  { %v137_v32 = vadd.f32 %v136_v16, %v56_v29  ;;  %v143_v34 = vadd.f32 %v142_v17, %v56_v29 }
  0xe9   :  { %v138_v18 = vpop.f32.mrf.mxu0  ;;  %v144_v19 = vpop.f32.mrf.mxu1 }
  0xea   :  { %v139_v20 = vadd.f32 %v138_v18, %v60_v15  ;;  %v145_v21 = vadd.f32 %v144_v19, %v60_v15 }
  0xec   :  { %v185_v22 = vmul.f32 -1.442695, %v139_v20  ;;  %v186_v23 = vmul.f32 -1.442695, %v145_v21 }
  0xee   :  { %203 = vpow2.f32 %v185_v22 }
  0xef   :  { %205 = vpow2.f32 %v186_v23 }
  0xfb   :  { %v204_v24 = vpop.eup %203 }
  0xfc   :  { %v206_v25 = vpop.eup %205  ;;  %v153_v26 = vadd.f32 1.0, %v204_v24 }
  0xfd   :  { %v154_v27 = vadd.f32 1.0, %v206_v25 }
  0xfe   :  { %207 = vrcp.f32 %v153_v26 }
  0xff   :  { %209 = vrcp.f32 %v154_v27 }
 0x10b   :  { %v208_v30 = vpop.eup %207 }
 0x10c   :  { %v210_v31 = vpop.eup %209  ;;  %v159_v33 = vmul.f32 %v208_v30, %v139_v20 }
 0x10d   :  { %v160_v35 = vmul.f32 %v210_v31, %v145_v21 }
 0x10e   :  { %v161_v36 = vmul.f32 %v159_v33, %v137_v32 }
 0x10f   :  { %v162_v37 = vmul.f32 %v160_v35, %v143_v34 }
 0x110   :  { %163 = vst [vmem:[#allocation7] sm:$0xff] %v161_v36 }
 0x111   :  { %164 = vst [vmem:[#allocation7 + $0x8] sm:$0xff] %v162_v37 }
 0x112   :  { %262 = shalt.err (!%p259_p0)
}
 0x113   :  { %176 = dma.vmem_to_hbm [thread:$0]  %s171_s1, 256, %s317_s2, [#allocation4], %s278_s12, %s278_s12, %s279_s13  }
 0x114   :  { %275 = dma.done.wait [#allocation4], 256  }
 0x115   :  { %276 = vsyncadd [#allocation4], 4294967040 }
 0x116   :  { %180 = vsyncpa [#allocation3], 1 }
 0x117   :  { %181 = vsyncpa [#allocation6], 1 }
 0x118   :  { %182 = vsyncpa [#allocation4], 1 }

</bundles_post_ra>
